<compile_context>
chip_gen: v7x
topology: tpu7x:2x2x1
jax: 0.10.0
libtpu: 0.0.40
codegen_flags: <defaults>
</compile_context>

<pallas_src>
import jax
import jax.numpy as jnp
from jax.experimental import pallas as pl
from jax.experimental.pallas import tpu as pltpu


def _round_up(x, m):
    return ((x + m - 1) // m) * m


def _pe_kernel(x_ref, w1_ref, b1_ref, w2_ref, b2_ref, o_ref):
    # x_ref : (TR, P*Cin)   -- P points packed per row
    # w1_ref: (P*Cin, P*E)  -- block-diagonal copies of conv1 weight (Cin, E)
    # b1_ref: (1, P*E)      -- conv1 bias tiled P times along lanes
    # w2_ref: (P*E, P*E)    -- block-diagonal copies of conv2 weight (E, E)
    # b2_ref: (1, P*E)
    # o_ref : (TR, P*E)     -- lane-dense (P*E == 128 for E == 32) output tile
    x = x_ref[...]
    h = jnp.dot(x, w1_ref[...], preferred_element_type=jnp.float32) + b1_ref[...]
    h = jnp.maximum(h, 0.0)                                   # ReLU
    o = jnp.dot(h, w2_ref[...], preferred_element_type=jnp.float32) + b2_ref[...]
    o_ref[...] = o.astype(o_ref.dtype)


def learned_abs_pe_3d_v2(xyz, w1, b1, w2, b2, *, tile_rows=512, out_dtype=None):
    """xyz: (B, N, input_dim) -> (B, N, embedding_dim).

    w1: (Cin, E), b1: (1, E)  == Conv1d(Cin, E, k=1) weight transposed / bias
    w2: (E, E),   b2: (1, E)  == Conv1d(E, E, k=1)  weight transposed / bias
    """
    B, N, Cin = xyz.shape
    Cin_w, E = w1.shape
    assert Cin_w == Cin
    out_dtype = out_dtype if out_dtype is not None else xyz.dtype

    # Pack P points per 128-lane row so the output store is unmasked / lane dense.
    P = 128 // E if (E <= 128 and 128 % E == 0) else 1

    M = B * N                       # total number of points
    R = pl.cdiv(M, P)               # packed rows required

    # Big tiles (amortize ~0.35 us per grid step) but keep >= 2 grid steps so the
    # v7x megacore can shard the "parallel" axis over both TensorCores.
    if R > 8:
        tr = min(tile_rows, _round_up(pl.cdiv(R, 2), 8))
    else:
        tr = _round_up(max(R, 1), 8)
    G = pl.cdiv(R, tr)
    R_pad = G * tr
    M_pad = R_pad * P

    # Flatten (B, N, Cin) -> (M, Cin), zero-pad to the padded grid, and view as
    # packed rows (row-major reshape: no data movement for the unpadded case).
    x_flat = xyz.reshape(M, Cin)
    if M_pad != M:
        x_flat = jnp.pad(x_flat, ((0, M_pad - M), (0, 0)))
    x_packed = x_flat.reshape(R_pad, P * Cin)

    # Block-diagonal weights / lane-tiled biases: applying them to a packed row is
    # exactly the per-point MLP applied independently to each of the P packed points
    # (off-diagonal blocks are exact zeros, so numerics are unchanged).
    w1_bd = jnp.kron(jnp.eye(P, dtype=w1.dtype), w1)   # (P*Cin, P*E)
    w2_bd = jnp.kron(jnp.eye(P, dtype=w2.dtype), w2)   # (P*E,  P*E)
    b1_t = jnp.tile(b1.reshape(1, E), (1, P))          # (1, P*E)
    b2_t = jnp.tile(b2.reshape(1, E), (1, P))          # (1, P*E)

    out_packed = pl.pallas_call(
        _pe_kernel,
        out_shape=jax.ShapeDtypeStruct((R_pad, P * E), out_dtype),
        grid_spec=pltpu.PrefetchScalarGridSpec(
            num_scalar_prefetch=0,
            grid=(G,),
            in_specs=[
                # Packed points: one (tr, P*Cin) slab per grid step.
                pl.BlockSpec((tr, P * Cin), lambda i: (i, 0)),
                # Weights / biases: constant block index -> fetched once, kept resident.
                pl.BlockSpec((P * Cin, P * E), lambda i: (0, 0)),
                pl.BlockSpec((1, P * E), lambda i: (0, 0)),
                pl.BlockSpec((P * E, P * E), lambda i: (0, 0)),
                pl.BlockSpec((1, P * E), lambda i: (0, 0)),
            ],
            out_specs=pl.BlockSpec((tr, P * E), lambda i: (i, 0)),
        ),
        compiler_params=pltpu.CompilerParams(
            dimension_semantics=("parallel",)
        ),
    )(x_packed, w1_bd, b1_t, w2_bd, b2_t)

    # (R_pad, P*E) is row-major identical to (M_pad, E); slice off the padding.
    return out_packed.reshape(M_pad, E)[:M].reshape(B, N, E)


def _reference(xyz, w1, b1, w2, b2):
    h = jnp.maximum(jnp.einsum("bnc,ce->bne", xyz, w1) + b1[0], 0.0)
    return jnp.einsum("bne,ef->bnf", h, w2) + b2[0]


if __name__ == "__main__":
    # Small shapes consistent with the module: xyz coords are 3-D points.
    # N is deliberately not a multiple of the tile to exercise the padding path.
    B, N, INPUT_DIM, EMB_DIM = 2, 1000, 3, 32

    key = jax.random.PRNGKey(0)
    k_x, k_w1, k_b1, k_w2, k_b2 = jax.random.split(key, 5)

    xyz = jax.random.normal(k_x, (B, N, INPUT_DIM), dtype=jnp.float32)

    # Conv1d(3, E, k=1) weights: PyTorch shape (E, 3, 1) -> stored transposed (3, E).
    w1 = jax.random.normal(k_w1, (INPUT_DIM, EMB_DIM), dtype=jnp.float32) * 0.1
    b1 = jax.random.normal(k_b1, (1, EMB_DIM), dtype=jnp.float32) * 0.1
    # Conv1d(E, E, k=1) weights: PyTorch shape (E, E, 1) -> stored transposed (E, E).
    w2 = jax.random.normal(k_w2, (EMB_DIM, EMB_DIM), dtype=jnp.float32) * 0.1
    b2 = jax.random.normal(k_b2, (1, EMB_DIM), dtype=jnp.float32) * 0.1

    out = learned_abs_pe_3d_v2(xyz, w1, b1, w2, b2)
    out = jax.block_until_ready(out)

    ref = _reference(xyz, w1, b1, w2, b2)
    assert out.shape == (B, N, EMB_DIM)
    assert jnp.allclose(out, ref, atol=1e-5, rtol=1e-5), float(
        jnp.max(jnp.abs(out - ref))
    )

    print("KERNEL_OK")
</pallas_src>

<mosaic_0001>
module attributes {stable_mosaic.version = 11 : i64} {
  func.func @_pe_kernel(%arg0: i32, %arg1: memref<256x12xf32, #tpu.memory_space<vmem>>, %arg2: memref<12x128xf32, #tpu.memory_space<vmem>>, %arg3: memref<1x128xf32, #tpu.memory_space<vmem>>, %arg4: memref<128x128xf32, #tpu.memory_space<vmem>>, %arg5: memref<1x128xf32, #tpu.memory_space<vmem>>, %arg6: memref<256x128xf32, #tpu.memory_space<vmem>>) attributes {dimension_semantics = [#tpu.dimension_semantics<parallel>], iteration_bounds = array<i64: 2>, scalar_prefetch = 0 : i64, scratch_operands = 0 : i64, tpu.core_type = #tpu.core_type<tc>, window_params = [{transform_indices = @transform_0, window_bounds = array<i64: 256, 12>}, {pipeline_mode = #tpu.pipeline_mode<synchronous>, transform_indices = @transform_1, window_bounds = array<i64: 12, 128>}, {pipeline_mode = #tpu.pipeline_mode<synchronous>, transform_indices = @transform_2, window_bounds = array<i64: 1, 128>}, {pipeline_mode = #tpu.pipeline_mode<synchronous>, transform_indices = @transform_3, window_bounds = array<i64: 128, 128>}, {pipeline_mode = #tpu.pipeline_mode<synchronous>, transform_indices = @transform_4, window_bounds = array<i64: 1, 128>}, {transform_indices = @transform_5, window_bounds = array<i64: 256, 128>}]} {
    %c0 = arith.constant 0 : index
    %c0_0 = arith.constant 0 : index
    %0 = vector.load %arg1[%c0, %c0_0] : memref<256x12xf32, #tpu.memory_space<vmem>>, vector<256x12xf32>
    %c0_1 = arith.constant 0 : index
    %c0_2 = arith.constant 0 : index
    %1 = vector.load %arg2[%c0_1, %c0_2] : memref<12x128xf32, #tpu.memory_space<vmem>>, vector<12x128xf32>
    %cst = arith.constant dense<0.000000e+00> : vector<256x128xf32>
    %2 = tpu.matmul %0, %1, %cst {dimension_numbers = #tpu.dot_dimension_numbers<[1], [0], [0], [1], [0, 0, 1, 1], [], []>} : vector<256x12xf32>, vector<12x128xf32>, vector<256x128xf32> -> vector<256x128xf32>
    %c0_3 = arith.constant 0 : index
    %c0_4 = arith.constant 0 : index
    %3 = vector.load %arg3[%c0_3, %c0_4] : memref<1x128xf32, #tpu.memory_space<vmem>>, vector<1x128xf32>
    %4 = vector.broadcast %3 : vector<1x128xf32> to vector<256x128xf32>
    %5 = arith.addf %2, %4 : vector<256x128xf32>
    %cst_5 = arith.constant 0.000000e+00 : f32
    %6 = vector.broadcast %cst_5 : f32 to vector<256x128xf32>
    %7 = arith.maximumf %5, %6 : vector<256x128xf32>
    %c0_6 = arith.constant 0 : index
    %c0_7 = arith.constant 0 : index
    %8 = vector.load %arg4[%c0_6, %c0_7] : memref<128x128xf32, #tpu.memory_space<vmem>>, vector<128x128xf32>
    %cst_8 = arith.constant dense<0.000000e+00> : vector<256x128xf32>
    %9 = tpu.matmul %7, %8, %cst_8 {dimension_numbers = #tpu.dot_dimension_numbers<[1], [0], [0], [1], [0, 0, 1, 1], [], []>} : vector<256x128xf32>, vector<128x128xf32>, vector<256x128xf32> -> vector<256x128xf32>
    %c0_9 = arith.constant 0 : index
    %c0_10 = arith.constant 0 : index
    %10 = vector.load %arg5[%c0_9, %c0_10] : memref<1x128xf32, #tpu.memory_space<vmem>>, vector<1x128xf32>
    %11 = vector.broadcast %10 : vector<1x128xf32> to vector<256x128xf32>
    %12 = arith.addf %9, %11 : vector<256x128xf32>
    %c0_11 = arith.constant 0 : index
    %c0_12 = arith.constant 0 : index
    %13 = vector.load %arg6[%c0_11, %c0_12] : memref<256x128xf32, #tpu.memory_space<vmem>>, vector<256x128xf32>
    tpu.vector_store %arg6[%c0_11, %c0_12], %12 {strides = array<i32>} : memref<256x128xf32, #tpu.memory_space<vmem>>, vector<256x128xf32>,
    return
  }
  func.func @transform_0(%arg0: i32) -> (i32, i32) {
    %c0_i32 = arith.constant 0 : i32
    %c0_i32_0 = arith.constant 0 : i32
    return %arg0, %c0_i32 : i32, i32
  }
  func.func @transform_1(%arg0: i32) -> (i32, i32) {
    %c0_i32 = arith.constant 0 : i32
    %c0_i32_0 = arith.constant 0 : i32
    %c0_i32_1 = arith.constant 0 : i32
    return %c0_i32, %c0_i32_0 : i32, i32
  }
  func.func @transform_2(%arg0: i32) -> (i32, i32) {
    %c0_i32 = arith.constant 0 : i32
    %c0_i32_0 = arith.constant 0 : i32
    %c0_i32_1 = arith.constant 0 : i32
    return %c0_i32, %c0_i32_0 : i32, i32
  }
  func.func @transform_3(%arg0: i32) -> (i32, i32) {
    %c0_i32 = arith.constant 0 : i32
    %c0_i32_0 = arith.constant 0 : i32
    %c0_i32_1 = arith.constant 0 : i32
    return %c0_i32, %c0_i32_0 : i32, i32
  }
  func.func @transform_4(%arg0: i32) -> (i32, i32) {
    %c0_i32 = arith.constant 0 : i32
    %c0_i32_0 = arith.constant 0 : i32
    %c0_i32_1 = arith.constant 0 : i32
    return %c0_i32, %c0_i32_0 : i32, i32
  }
  func.func @transform_5(%arg0: i32) -> (i32, i32) {
    %c0_i32 = arith.constant 0 : i32
    %c0_i32_0 = arith.constant 0 : i32
    return %arg0, %c0_i32 : i32, i32
  }
}

</mosaic_0001>

<bundles_post_ra>
// kernel: tpu_custom_call.1
= control target key start
LH: loop header
LB: loop body
LE: loop exit
PB: predicated region body
PF: predicated region fallthrough
CT: control target
= control target key end

     0   :  { %10 = vsyncpa [#allocation3], 0  ;;  %s1772_s0 = inlined_call_operand.vmem [shape: f32[512,12], index: 0, kind: input, shape index: {}]   ;;  %s1773_s1 = inlined_call_operand.vmem [shape: f32[12,128], index: 1, kind: input, shape index: {}]   ;;  %s1774_s2 = inlined_call_operand.vmem [shape: f32[1,128], index: 2, kind: input, shape index: {}]   ;;  %s1775_s3 = inlined_call_operand.vmem [shape: f32[128,128], index: 3, kind: input, shape index: {}]   ;;  %s1776_s4 = inlined_call_operand.vmem [shape: f32[1,128], index: 4, kind: input, shape index: {}]   ;;  %s1777_s5 = inlined_call_operand.hbm [shape: f32[512,128], index: 5, kind: output, shape index: {}]  }
   0x1   :  { %12 = vsyncpa [#allocation3 + $0x1], 0  ;;  %s1437_s18 = smov 0   ;;  %s1439_s19 = smov 0  }
   0x2   :  { %s1441_s20 = smov 0   ;;  %s1443_s21 = smov 0  }
   0x3 LB: > { %s1458_s22 = sadd.s32 4294967295, %s1401_s21   ;;  %s981_s23 = sadd.s32 4294967294, %s1401_s21   ;;  %s1401_s21 = sphi %s1443_s21, %s1783_s21   ;;  %s1397_s20 = sphi %s1441_s20, %s1782_s20   ;;  %s1393_s19 = sphi %s1439_s19, %s1781_s19   ;;  %s1389_s18 = sphi %s1437_s18, %s1780_s18  }
   0x4   : > { %s1462_s24 = sadd.s32 1, %s1401_s21   ;;  %s135_s25 = sadd.s32 1, %s1397_s20 }
   0x5   : > { %s132_s26 = ssub.s32 %s1401_s21, %s1462_s24  ;;  %p145_p0 = scmp.ne.s32.totalorder %s1397_s20, %s1393_s19 }
   0x6   : > { %p133_p1 = scmp.eq.s32.totalorder %s132_s26, 0  ;;  %p146_p2 = scmp.eq.s32.totalorder %s1458_s22, 1 }
   0x7   : > { %p151_p3 = scmp.ne.s32.totalorder %s1393_s19, %s1389_s18  ;;  %p152_p4 = scmp.eq.s32.totalorder %s981_s23, 1 }
   0x8   : > { %s1473_s27 = scalar_select %p133_p1, %s1397_s20, %s135_s25  }
   0x9   : > { %p1475_p5 = por %p146_p2, %p145_p0  ;;  %p1479_p6 = por %p152_p4, %p151_p3 }
   0xa   : > { %p984_p7 = scmp.ge.s32.totalorder %s1401_s21, 1  ;;  %p191_p8 = scmp.lt.s32.totalorder %s1401_s21, 3 }
   0xc   : > { %p192_p9 = pnand %p984_p7, %p191_p8 }
   0xd   : > { %v258_v0 = vld [vmem:[%s1773_s1] sm:$0xff] (!%p192_p9)  ;;  %v259_v1 = vld [vmem:[%s1773_s1 + $0x8] sm:$0xf] (!%p192_p9)  ;;  %vm364_vm0 = vcmask (!%p192_p9), 1043456   ;;  %s986_s9 = sshll.u32 (!%p192_p9), %s1458_s22, 5  ;;  %vm1403_vm1 = vmmov (!%p192_p9), 1  }
   0xe   : > { %195 = sbr.rel (%p192_p9) target bundleno = 534 (0x216), region = 40  ;;  %v1243_v2 = vpack.c.bf16 (!%p192_p9), %v259_v1, %v258_v0  ;;  %vm1244_vm2 = vmpackc.low (!%p192_p9), %vm364_vm0, %vm1403_vm1  ;;  %p220_p10 = scmp.lt.s32.totalorder (!%p192_p9), %s986_s9, 63  ;;  %v625_v3 = vld [vmem:[%s1775_s3] sm:$0xff] (!%p192_p9)  ;;  %v626_v4 = vld [vmem:[%s1775_s3 + $0x8] sm:$0xff] (!%p192_p9)  ;;  %vm267_vm3 = vcmask (!%p192_p9), 97280  }
   0xf   : > { %v1249_v5 = vpack.c.bf16 (!%p192_p9), %v626_v4, %v625_v3  ;;  %v627_v6 = vld [vmem:[%s1775_s3 + $0x10] sm:$0xff] (!%p192_p9)  ;;  %v628_v7 = vld [vmem:[%s1775_s3 + $0x18] sm:$0xff] (!%p192_p9)  ;;  %v629_v9 = vld [vmem:[%s1775_s3 + $0x20] sm:$0xff] (!%p192_p9)  ;;  %s1028_s6 = sshll.u32 (!%p192_p9), %s1458_s22, 12  ;;  %s1404_s12 = smov (!%p192_p9), [#allocation2]  }
  0x10   : > { %1245 = vmatprep.subr.msk.bf16.mxu0 (!%p192_p9), %vm1244_vm2, %v1243_v2  ;;  %v1253_v8 = vpack.c.bf16 (!%p192_p9), %v628_v7, %v627_v6  ;;  %v630_v10 = vld [vmem:[%s1775_s3 + $0x28] sm:$0xff] (!%p192_p9)  ;;  %v631_v16 = vld [vmem:[%s1775_s3 + $0x30] sm:$0xff] (!%p192_p9)  ;;  %v632_v17 = vld [vmem:[%s1775_s3 + $0x38] sm:$0xff] (!%p192_p9)  ;;  %s1343_s13 = sshll.u32 (!%p192_p9), %s1404_s12, 4  ;;  %s1344_s13 = int_to_ptr.vmem [resolvable:$false] %s1343_s13 }
  0x11   : > { %1248 = vmatpush3.bf16.msk.msra.mxu0 (!%p192_p9), %vm1244_vm2, %v1243_v2  ;;  %1281 = vmatprep.subr.bf16.mxu1 (!%p192_p9), %v1249_v5  ;;  %v1257_v14 = vpack.c.bf16 (!%p192_p9), %v630_v10, %v629_v9  ;;  %v1261_v19 = vpack.c.bf16 (!%p192_p9), %v632_v17, %v631_v16  ;;  %v633_v21 = vld [vmem:[%s1775_s3 + $0x40] sm:$0xff] (!%p192_p9)  ;;  %v634_v22 = vld [vmem:[%s1775_s3 + $0x48] sm:$0xff] (!%p192_p9)  ;;  %v635_v26 = vld [vmem:[%s1775_s3 + $0x50] sm:$0xff] (!%p192_p9)  ;;  %s1345_s14 = scalar_lea.vmem (!%p192_p9), %s1344_s13, 8192 }
  0x12   : > { %1250 = vmatprep.subr.bf16.mxu0 (!%p192_p9), %v1249_v5  ;;  %1289 = vmatpush3.bf16.msra.mxu1 (!%p192_p9), %v1249_v5  ;;  %v1265_v24 = vpack.c.bf16 (!%p192_p9), %v634_v22, %v633_v21  ;;  %v636_v27 = vld [vmem:[%s1775_s3 + $0x58] sm:$0xff] (!%p192_p9)  ;;  %v637_v31 = vld [vmem:[%s1775_s3 + $0x60] sm:$0xff] (!%p192_p9)  ;;  %v638_v32 = vld [vmem:[%s1775_s3 + $0x68] sm:$0xff] (!%p192_p9) }
  0x13   : > { %1282 = vmatprep.subr.bf16.mxu1 (!%p192_p9), %v1253_v8  ;;  %v1269_v29 = vpack.c.bf16 (!%p192_p9), %v636_v27, %v635_v26  ;;  %v1273_v34 = vpack.c.bf16 (!%p192_p9), %v638_v32, %v637_v31  ;;  %v639_v56 = vld [vmem:[%s1775_s3 + $0x70] sm:$0xff] (!%p192_p9)  ;;  %v640_v57 = vld [vmem:[%s1775_s3 + $0x78] sm:$0xff] (!%p192_p9)  ;;  %v1612_v59 = vld [vmem:[%s1774_s2] ss:$0 sm:$0xff] (!%p192_p9) }
  0x14   : > { %v1277_v58 = vpack.c.bf16 (!%p192_p9), %v640_v57, %v639_v56 }
  0x15   : > { %s1785_s9 = smov (!%p220_p10, %s986_s9), 63 }
  0x16   : > { %s987_s23 = sshll.u32 %s1785_s9, 3  ;;  %1290 = vmatpush3.bf16.msra.mxu1 %v1253_v8  ;;  %s1722_s9 = scalar_lea.hbm %s1777_s5, %s1028_s6 }
  0x17   : > { %s1507_s30 = scalar_lea.vmem %s1772_s0, %s987_s23  ;;  %1283 = vmatprep.subr.bf16.mxu1 %v1257_v14 }
  0x18   : > { %v226_v11 = vld [vmem:[%s1507_s30] sm:$0xff]  ;;  %v227_v12 = vld [vmem:[%s1507_s30 + $0x8] sm:$0xff]  ;;  %v228_v13 = vld [vmem:[%s1507_s30 + $0x10] sm:$0xff] }
  0x19   : > { %1115 = vmatprep.mubr.msk.f32.mxu0 %vm267_vm3, %v226_v11  ;;  %v229_v15 = vld [vmem:[%s1507_s30 + $0x18] sm:$0xff]  ;;  %v230_v18 = vld [vmem:[%s1507_s30 + $0x20] sm:$0xff]  ;;  %v231_v20 = vld [vmem:[%s1507_s30 + $0x28] sm:$0xff] }
  0x1a   : > { %1116 = vmatmul.mubr.msk.f32.vlgmr.msra.gmra.mrb[0].mxu0 %vm267_vm3, %v227_v12  ;;  %1291 = vmatpush3.bf16.msra.mxu1 %v1257_v14  ;;  %v232_v23 = vld [vmem:[%s1507_s30 + $0x30] sm:$0xff]  ;;  %v233_v25 = vld [vmem:[%s1507_s30 + $0x38] sm:$0xff]  ;;  %v234_v28 = vld [vmem:[%s1507_s30 + $0x40] sm:$0xff] }
  0x1b   : > { %1118 = vmatprep.mubr.msk.f32.mxu0 %vm267_vm3, %v228_v13  ;;  %1252 = vmatpush3.bf16.msra.mxu0 %v1249_v5  ;;  %v235_v30 = vld [vmem:[%s1507_s30 + $0x48] sm:$0xff]  ;;  %v236_v33 = vld [vmem:[%s1507_s30 + $0x50] sm:$0xff]  ;;  %v237_v35 = vld [vmem:[%s1507_s30 + $0x58] sm:$0xff] }
  0x1c   : > { %1254 = vmatprep.subr.bf16.mxu0 %v1253_v8  ;;  %1284 = vmatprep.subr.bf16.mxu1 %v1261_v19  ;;  %v238_v36 = vld [vmem:[%s1507_s30 + $0x60] sm:$0xff]  ;;  %v239_v37 = vld [vmem:[%s1507_s30 + $0x68] sm:$0xff]  ;;  %v240_v38 = vld [vmem:[%s1507_s30 + $0x70] sm:$0xff] }
  0x1d   : > { %v241_v39 = vld [vmem:[%s1507_s30 + $0x78] sm:$0xff]  ;;  %v242_v40 = vld [vmem:[%s1507_s30 + $0x80] sm:$0xff]  ;;  %v243_v41 = vld [vmem:[%s1507_s30 + $0x88] sm:$0xff] }
  0x1e   : > { %1119 = vmatmul.mubr.msk.f32.gmra.mrb[2].mxu0 %vm267_vm3, %v229_v15  ;;  %1292 = vmatpush3.bf16.msra.mxu1 %v1261_v19  ;;  %v244_v42 = vld [vmem:[%s1507_s30 + $0x90] sm:$0xff]  ;;  %v245_v43 = vld [vmem:[%s1507_s30 + $0x98] sm:$0xff]  ;;  %v246_v44 = vld [vmem:[%s1507_s30 + $0xa0] sm:$0xff] }
  0x1f   : > { %1121 = vmatprep.mubr.msk.f32.mxu0 %vm267_vm3, %v230_v18  ;;  %1256 = vmatpush3.bf16.msra.mxu0 %v1253_v8  ;;  %v247_v45 = vld [vmem:[%s1507_s30 + $0xa8] sm:$0xff]  ;;  %v248_v46 = vld [vmem:[%s1507_s30 + $0xb0] sm:$0xff]  ;;  %v249_v47 = vld [vmem:[%s1507_s30 + $0xb8] sm:$0xff] }
  0x20   : > { %1258 = vmatprep.subr.bf16.mxu0 %v1257_v14  ;;  %1285 = vmatprep.subr.bf16.mxu1 %v1265_v24  ;;  %v250_v48 = vld [vmem:[%s1507_s30 + $0xc0] sm:$0xff]  ;;  %v251_v49 = vld [vmem:[%s1507_s30 + $0xc8] sm:$0xff]  ;;  %v252_v50 = vld [vmem:[%s1507_s30 + $0xd0] sm:$0xff] }
  0x21   : > { %v253_v51 = vld [vmem:[%s1507_s30 + $0xd8] sm:$0xff]  ;;  %v254_v52 = vld [vmem:[%s1507_s30 + $0xe0] sm:$0xff]  ;;  %v255_v53 = vld [vmem:[%s1507_s30 + $0xe8] sm:$0xff] }
  0x22   : > { %1122 = vmatmul.mubr.msk.f32.gmra.mrb[4].mxu0 %vm267_vm3, %v231_v20  ;;  %1293 = vmatpush3.bf16.msra.mxu1 %v1265_v24  ;;  %v256_v54 = vld [vmem:[%s1507_s30 + $0xf0] sm:$0xff]  ;;  %v257_v55 = vld [vmem:[%s1507_s30 + $0xf8] sm:$0xff]  ;;  %s216_s30 = sand.u32 1, %s1393_s19  }
  0x23   : > { %1124 = vmatprep.mubr.msk.f32.mxu0 %vm267_vm3, %v232_v23  ;;  %1260 = vmatpush3.bf16.msra.mxu0 %v1257_v14  ;;  %s985_s17 = sshll.u32 %s216_s30, 8  ;;  %s1731_s22 = scalar_lea.sflag [#allocation3], %s216_s30 }
  0x24   : > { %1262 = vmatprep.subr.bf16.mxu0 %v1261_v19  ;;  %1286 = vmatprep.subr.bf16.mxu1 %v1269_v29  ;;  %s1656_s26 = scalar_lea.vmem [#allocation2], %s985_s17 }
  0x25   : > { %s919_s7 = sshll.u32 %s1656_s26, 4  ;;  %s1724_s7 = int_to_ptr.vmem [resolvable:$true] %s919_s7 }
  0x26   : > { %1125 = vmatmul.mubr.msk.f32.gmra.mrb[6].mxu0 %vm267_vm3, %v233_v25  ;;  %1294 = vmatpush3.bf16.msra.mxu1 %v1269_v29  ;;  %s1339_s11 = scalar_lea.vmem %s1724_s7, 4096  ;;  %p1346_p0 = scmp.lt.s32.totalorder %s1724_s7, %s1344_s13 }
  0x27   : > { %1127 = vmatprep.mubr.msk.f32.mxu0 %vm267_vm3, %v234_v28  ;;  %1264 = vmatpush3.bf16.msra.mxu0 %v1261_v19  ;;  %p1340_p11 = scmp.ne.s32.totalorder %s1724_s7, %s1339_s11  ;;  %p1347_p1 = scmp.lt.s32.totalorder %s1345_s14, %s1339_s11 }
  0x28   : > { %1266 = vmatprep.subr.bf16.mxu0 %v1265_v24  ;;  %1287 = vmatprep.subr.bf16.mxu1 %v1273_v34 }
  0x29   : > { %p1341_p12 = pnand %p1340_p11, %p1475_p5  ;;  %p1348_p2 = por %p1347_p1, %p1346_p0 }
  0x2a   : > { %1128 = vmatmul.mubr.msk.f32.gmra.mrb[8].mxu0 %vm267_vm3, %v235_v30  ;;  %1295 = vmatpush3.bf16.msra.mxu1 %v1273_v34 }
  0x2b   : > { %1130 = vmatprep.mubr.msk.f32.mxu0 %vm267_vm3, %v236_v33  ;;  %1268 = vmatpush3.bf16.msra.mxu0 %v1265_v24  ;;  %p1342_p13 = pneg %p1341_p12 }
  0x2c   : > { %1270 = vmatprep.subr.bf16.mxu0 %v1269_v29  ;;  %1288 = vmatprep.subr.bf16.mxu1 %v1277_v58 }
  0x2d   : > { %p1349_p3 = pnand %p1348_p2, %p1342_p13 }
  0x2e   : > { %1131 = vmatmul.mubr.msk.f32.gmra.mrb[10].mxu0 %vm267_vm3, %v237_v35  ;;  %1296 = vmatpush3.bf16.msra.mxu1 %v1277_v58 }
  0x2f   : > { %1133 = vmatprep.mubr.msk.f32.mxu0 %vm267_vm3, %v238_v36  ;;  %1272 = vmatpush3.bf16.msra.mxu0 %v1269_v29 }
  0x30   : > { %1274 = vmatprep.subr.bf16.mxu0 %v1273_v34 }
  0x32   : > { %1134 = vmatmul.mubr.msk.f32.gmra.mrb[12].mxu0 %vm267_vm3, %v239_v37 }
  0x33   : > { %1136 = vmatprep.mubr.msk.f32.mxu0 %vm267_vm3, %v240_v38  ;;  %1276 = vmatpush3.bf16.msra.mxu0 %v1273_v34 }
  0x34   : > { %1278 = vmatprep.subr.bf16.mxu0 %v1277_v58 }
  0x36   : > { %1137 = vmatmul.mubr.msk.f32.gmra.mrb[14].mxu0 %vm267_vm3, %v241_v39 }
  0x37   : > { %1139 = vmatprep.mubr.msk.f32.mxu0 %vm267_vm3, %v242_v40  ;;  %1280 = vmatpush3.bf16.msra.mxu0 %v1277_v58 }
  0x3a   : > { %1140 = vmatmul.mubr.msk.f32.gmra.mrb[16].mxu0 %vm267_vm3, %v243_v41 }
  0x3b   : > { %1142 = vmatprep.mubr.msk.f32.mxu0 %vm267_vm3, %v244_v42 }
  0x3e   : > { %1143 = vmatmul.mubr.msk.f32.gmra.mrb[18].mxu0 %vm267_vm3, %v245_v43 }
  0x3f   : > { %1145 = vmatprep.mubr.msk.f32.mxu0 %vm267_vm3, %v246_v44 }
  0x42   : > { %1146 = vmatmul.mubr.msk.f32.gmra.mrb[20].mxu0 %vm267_vm3, %v247_v45 }
  0x43   : > { %1148 = vmatprep.mubr.msk.f32.mxu0 %vm267_vm3, %v248_v46 }
  0x46   : > { %1149 = vmatmul.mubr.msk.f32.gmra.mrb[22].mxu0 %vm267_vm3, %v249_v47 }
  0x47   : > { %1151 = vmatprep.mubr.msk.f32.mxu0 %vm267_vm3, %v250_v48 }
  0x4a   : > { %1152 = vmatmul.mubr.msk.f32.gmra.mrb[24].mxu0 %vm267_vm3, %v251_v49 }
  0x4b   : > { %1154 = vmatprep.mubr.msk.f32.mxu0 %vm267_vm3, %v252_v50 }
  0x4e   : > { %1155 = vmatmul.mubr.msk.f32.gmra.mrb[26].mxu0 %vm267_vm3, %v253_v51 }
  0x4f   : > { %1157 = vmatprep.mubr.msk.f32.mxu0 %vm267_vm3, %v254_v52 }
  0x52   : > { %1158 = vmatmul.mubr.msk.f32.gmra.mrb[28].mxu0 %vm267_vm3, %v255_v53 }
  0x53   : > { %1160 = vmatprep.mubr.msk.f32.mxu0 %vm267_vm3, %v256_v54 }
  0x56   : > { %1161 = vmatmul.mubr.msk.f32.gmra.mrb[30].mxu0 %vm267_vm3, %v257_v55 }
  0xed   : > { %v1117_v60 = vpop.f32.mrb[0].mxu0 }
  0xee   : > { %v440_v61 = vadd.f32 %v1117_v60, %v1612_v59  ;;  %v434_v62 = vpop.f32.mrb[1].mxu0 }
  0xef   : > { %v435_v63 = vadd.f32 %v1612_v59, %v434_v62 }
  0xf0   : > { %v594_v2 = vmax.f32 %v440_v61, 0.0 }
  0xf1   : > { %v593_v0 = vmax.f32 %v435_v63, 0.0  ;;  %v1120_v1 = vpop.f32.mrb[2].mxu0 }
  0xf2   : > { %v450_v3 = vadd.f32 %v1120_v1, %v1612_v59  ;;  %v444_v4 = vpop.f32.mrb[3].mxu0 }
  0xf3   : > { %v445_v5 = vadd.f32 %v1612_v59, %v444_v4  ;;  %1195 = vmatprep.mubr.f32.mxu0 %v593_v0 }
  0xf4   : > { %1196 = vmatmul.mubr.f32.vlgmr.msra.gmra.mrb[32].mxu0 %v594_v2  ;;  %v596_v8 = vmax.f32 %v450_v3, 0.0 }
  0xf5   : > { %v595_v6 = vmax.f32 %v445_v5, 0.0  ;;  %v1123_v7 = vpop.f32.mrb[4].mxu0 }
  0xf6   : > { %v460_v9 = vadd.f32 %v1123_v7, %v1612_v59  ;;  %v454_v10 = vpop.f32.mrb[5].mxu0 }
  0xf7   : > { %v455_v11 = vadd.f32 %v1612_v59, %v454_v10  ;;  %1198 = vmatprep.mubr.f32.mxu0 %v595_v6 }
  0xf8   : > { %1199 = vmatmul.mubr.f32.gmra.mrb[34].mxu0 %v596_v8  ;;  %v598_v14 = vmax.f32 %v460_v9, 0.0 }
  0xf9   : > { %v597_v12 = vmax.f32 %v455_v11, 0.0  ;;  %v1126_v13 = vpop.f32.mrb[6].mxu0 }
  0xfa   : > { %v470_v15 = vadd.f32 %v1126_v13, %v1612_v59  ;;  %v464_v16 = vpop.f32.mrb[7].mxu0 }
  0xfb   : > { %1201 = vmatprep.mubr.f32.mxu0 %v597_v12  ;;  %v465_v17 = vadd.f32 %v1612_v59, %v464_v16 }
  0xfc   : > { %1202 = vmatmul.mubr.f32.gmra.mrb[36].mxu0 %v598_v14  ;;  %v600_v20 = vmax.f32 %v470_v15, 0.0 }
  0xfd   : > { %v1129_v18 = vpop.f32.mrb[8].mxu0  ;;  %v599_v19 = vmax.f32 %v465_v17, 0.0 }
  0xfe   : > { %v480_v21 = vadd.f32 %v1129_v18, %v1612_v59  ;;  %v474_v22 = vpop.f32.mrb[9].mxu0 }
  0xff   : > { %v475_v23 = vadd.f32 %v1612_v59, %v474_v22  ;;  %1204 = vmatprep.mubr.f32.mxu1 %v599_v19 }
 0x100   : > { %1205 = vmatmul.mubr.f32.vlgmr.msra.gmra.mrb[0].mxu1 %v600_v20  ;;  %v602_v26 = vmax.f32 %v480_v21, 0.0 }
 0x101   : > { %v601_v24 = vmax.f32 %v475_v23, 0.0  ;;  %v1132_v25 = vpop.f32.mrb[10].mxu0 }
 0x102   : > { %v490_v27 = vadd.f32 %v1132_v25, %v1612_v59  ;;  %v484_v28 = vpop.f32.mrb[11].mxu0 }
 0x103   : > { %v485_v29 = vadd.f32 %v1612_v59, %v484_v28  ;;  %1207 = vmatprep.mubr.f32.mxu1 %v601_v24 }
 0x104   : > { %1208 = vmatmul.mubr.f32.gmra.mrb[2].mxu1 %v602_v26  ;;  %v604_v32 = vmax.f32 %v490_v27, 0.0 }
 0x105   : > { %v603_v30 = vmax.f32 %v485_v29, 0.0  ;;  %v1135_v31 = vpop.f32.mrb[12].mxu0  ;;  %v1652_v29 = vld [vmem:[%s1776_s4] ss:$0 sm:$0xff] }
 0x106   : > { %v500_v33 = vadd.f32 %v1135_v31, %v1612_v59  ;;  %v494_v34 = vpop.f32.mrb[13].mxu0 }
 0x107   : > { %v495_v35 = vadd.f32 %v1612_v59, %v494_v34  ;;  %1210 = vmatprep.mubr.f32.mxu1 %v603_v30 }
 0x108   : > { %1211 = vmatmul.mubr.f32.gmra.mrb[4].mxu1 %v604_v32  ;;  %v606_v38 = vmax.f32 %v500_v33, 0.0 }
 0x109   : > { %v605_v36 = vmax.f32 %v495_v35, 0.0  ;;  %v1138_v37 = vpop.f32.mrb[14].mxu0 }
 0x10a   : > { %v510_v39 = vadd.f32 %v1138_v37, %v1612_v59  ;;  %v504_v40 = vpop.f32.mrb[15].mxu0 }
 0x10b   : > { %v505_v41 = vadd.f32 %v1612_v59, %v504_v40  ;;  %1213 = vmatprep.mubr.f32.mxu1 %v605_v36 }
 0x10c   : > { %1214 = vmatmul.mubr.f32.gmra.mrb[6].mxu1 %v606_v38  ;;  %v608_v44 = vmax.f32 %v510_v39, 0.0 }
 0x10d   : > { %v607_v42 = vmax.f32 %v505_v41, 0.0  ;;  %v1141_v43 = vpop.f32.mrb[16].mxu0 }
 0x10e   : > { %v520_v45 = vadd.f32 %v1141_v43, %v1612_v59  ;;  %v514_v46 = vpop.f32.mrb[17].mxu0 }
 0x10f   : > { %v515_v47 = vadd.f32 %v1612_v59, %v514_v46  ;;  %1216 = vmatprep.mubr.f32.mxu1 %v607_v42 }
 0x110   : > { %1217 = vmatmul.mubr.f32.gmra.mrb[8].mxu1 %v608_v44  ;;  %v610_v50 = vmax.f32 %v520_v45, 0.0 }
 0x111   : > { %v609_v48 = vmax.f32 %v515_v47, 0.0  ;;  %v1144_v49 = vpop.f32.mrb[18].mxu0 }
 0x112   : > { %v530_v51 = vadd.f32 %v1144_v49, %v1612_v59  ;;  %v524_v52 = vpop.f32.mrb[19].mxu0 }
 0x113   : > { %v525_v53 = vadd.f32 %v1612_v59, %v524_v52  ;;  %1219 = vmatprep.mubr.f32.mxu1 %v609_v48 }
 0x114   : > { %1220 = vmatmul.mubr.f32.gmra.mrb[10].mxu1 %v610_v50  ;;  %v612_v56 = vmax.f32 %v530_v51, 0.0 }
 0x115   : > { %v611_v54 = vmax.f32 %v525_v53, 0.0  ;;  %v1147_v55 = vpop.f32.mrb[20].mxu0 }
 0x116   : > { %v540_v57 = vadd.f32 %v1147_v55, %v1612_v59  ;;  %v534_v58 = vpop.f32.mrb[21].mxu0 }
 0x117   : > { %v535_v60 = vadd.f32 %v1612_v59, %v534_v58  ;;  %1222 = vmatprep.mubr.f32.mxu1 %v611_v54 }
 0x118   : > { %1223 = vmatmul.mubr.f32.gmra.mrb[12].mxu1 %v612_v56  ;;  %v614_v63 = vmax.f32 %v540_v57, 0.0 }
 0x119   : > { %v613_v61 = vmax.f32 %v535_v60, 0.0  ;;  %v1150_v62 = vpop.f32.mrb[22].mxu0 }
 0x11a   : > { %v550_v0 = vadd.f32 %v1150_v62, %v1612_v59  ;;  %v544_v1 = vpop.f32.mrb[23].mxu0 }
 0x11b   : > { %v545_v2 = vadd.f32 %v1612_v59, %v544_v1  ;;  %1225 = vmatprep.mubr.f32.mxu1 %v613_v61 }
 0x11c   : > { %1226 = vmatmul.mubr.f32.gmra.mrb[14].mxu1 %v614_v63  ;;  %v616_v5 = vmax.f32 %v550_v0, 0.0 }
 0x11d   : > { %v615_v3 = vmax.f32 %v545_v2, 0.0  ;;  %v1153_v4 = vpop.f32.mrb[24].mxu0 }
 0x11e   : > { %v560_v6 = vadd.f32 %v1153_v4, %v1612_v59  ;;  %v554_v7 = vpop.f32.mrb[25].mxu0 }
 0x11f   : > { %v555_v8 = vadd.f32 %v1612_v59, %v554_v7  ;;  %1228 = vmatprep.mubr.f32.mxu1 %v615_v3 }
 0x120   : > { %1229 = vmatmul.mubr.f32.gmra.mrb[16].mxu1 %v616_v5  ;;  %v618_v11 = vmax.f32 %v560_v6, 0.0 }
 0x121   : > { %v617_v9 = vmax.f32 %v555_v8, 0.0  ;;  %v1156_v10 = vpop.f32.mrb[26].mxu0 }
 0x122   : > { %v570_v12 = vadd.f32 %v1156_v10, %v1612_v59  ;;  %v564_v13 = vpop.f32.mrb[27].mxu0 }
 0x123   : > { %v565_v14 = vadd.f32 %v1612_v59, %v564_v13  ;;  %1231 = vmatprep.mubr.f32.mxu1 %v617_v9 }
 0x124   : > { %1232 = vmatmul.mubr.f32.gmra.mrb[18].mxu1 %v618_v11  ;;  %v620_v17 = vmax.f32 %v570_v12, 0.0 }
 0x125   : > { %v619_v15 = vmax.f32 %v565_v14, 0.0  ;;  %v1159_v16 = vpop.f32.mrb[28].mxu0 }
 0x126   : > { %v580_v18 = vadd.f32 %v1159_v16, %v1612_v59  ;;  %v574_v19 = vpop.f32.mrb[29].mxu0 }
 0x127   : > { %v575_v20 = vadd.f32 %v1612_v59, %v574_v19  ;;  %1234 = vmatprep.mubr.f32.mxu1 %v619_v15 }
 0x128   : > { %1235 = vmatmul.mubr.f32.gmra.mrb[20].mxu1 %v620_v17  ;;  %v622_v23 = vmax.f32 %v580_v18, 0.0 }
 0x129   : > { %v621_v21 = vmax.f32 %v575_v20, 0.0  ;;  %v1162_v22 = vpop.f32.mrb[30].mxu0 }
 0x12a   : > { %v590_v24 = vadd.f32 %v1162_v22, %v1612_v59  ;;  %v584_v25 = vpop.f32.mrb[31].mxu0 }
 0x12b   : > { %v585_v26 = vadd.f32 %v1612_v59, %v584_v25  ;;  %1237 = vmatprep.mubr.f32.mxu1 %v621_v21 }
 0x12c   : > { %1238 = vmatmul.mubr.f32.gmra.mrb[22].mxu1 %v622_v23  ;;  %v624_v28 = vmax.f32 %v590_v24, 0.0 }
 0x12d   : > { %v623_v27 = vmax.f32 %v585_v26, 0.0 }
 0x12f   : > { %1240 = vmatprep.mubr.f32.mxu1 %v623_v27 }
 0x130   : > { %1241 = vmatmul.mubr.f32.gmra.mrb[24].mxu1 %v624_v28 }
 0x1c7   : > { %v1197_v30 = vpop.f32.mrb[32].mxu0 }
 0x1c8   : > { %v720_v31 = vadd.f32 %v1197_v30, %v1652_v29  ;;  %v714_v32 = vpop.f32.mrb[33].mxu0 }
 0x1c9   : > { %v715_v59 = vadd.f32 %v1652_v29, %v714_v32 }
 0x1ca   : > { %874 = vst [vmem:[%s1656_s26 + $0x8] sm:$0xff] %v720_v31 }
 0x1cb   : > { %873 = vst [vmem:[%s1656_s26] sm:$0xff] %v715_v59  ;;  %v1200_v33 = vpop.f32.mrb[34].mxu0 }
 0x1cc   : > { %v730_v34 = vadd.f32 %v1200_v33, %v1652_v29  ;;  %v724_v35 = vpop.f32.mrb[35].mxu0 }
 0x1cd   : > { %v725_v36 = vadd.f32 %v1652_v29, %v724_v35 }
 0x1ce   : > { %876 = vst [vmem:[%s1656_s26 + $0x18] sm:$0xff] %v730_v34 }
 0x1cf   : > { %875 = vst [vmem:[%s1656_s26 + $0x10] sm:$0xff] %v725_v36  ;;  %v1203_v37 = vpop.f32.mrb[36].mxu0 }
 0x1d0   : > { %v740_v38 = vadd.f32 %v1203_v37, %v1652_v29  ;;  %v734_v39 = vpop.f32.mrb[37].mxu0 }
 0x1d1   : > { %v735_v40 = vadd.f32 %v1652_v29, %v734_v39 }
 0x1d2   : > { %878 = vst [vmem:[%s1656_s26 + $0x28] sm:$0xff] %v740_v38 }
 0x1d3   : > { %877 = vst [vmem:[%s1656_s26 + $0x20] sm:$0xff] %v735_v40  ;;  %v1206_v41 = vpop.f32.mrb[0].mxu1 }
 0x1d4   : > { %v750_v42 = vadd.f32 %v1206_v41, %v1652_v29  ;;  %v744_v43 = vpop.f32.mrb[1].mxu1 }
 0x1d5   : > { %v745_v44 = vadd.f32 %v1652_v29, %v744_v43 }
 0x1d6   : > { %880 = vst [vmem:[%s1656_s26 + $0x38] sm:$0xff] %v750_v42 }
 0x1d7   : > { %879 = vst [vmem:[%s1656_s26 + $0x30] sm:$0xff] %v745_v44  ;;  %v1209_v45 = vpop.f32.mrb[2].mxu1 }
 0x1d8   : > { %v760_v46 = vadd.f32 %v1209_v45, %v1652_v29  ;;  %v754_v47 = vpop.f32.mrb[3].mxu1 }
 0x1d9   : > { %v755_v48 = vadd.f32 %v1652_v29, %v754_v47 }
 0x1da   : > { %882 = vst [vmem:[%s1656_s26 + $0x48] sm:$0xff] %v760_v46 }
 0x1db   : > { %881 = vst [vmem:[%s1656_s26 + $0x40] sm:$0xff] %v755_v48  ;;  %v1212_v49 = vpop.f32.mrb[4].mxu1 }
 0x1dc   : > { %v770_v50 = vadd.f32 %v1212_v49, %v1652_v29  ;;  %v764_v51 = vpop.f32.mrb[5].mxu1 }
 0x1dd   : > { %v765_v52 = vadd.f32 %v1652_v29, %v764_v51 }
 0x1de   : > { %884 = vst [vmem:[%s1656_s26 + $0x58] sm:$0xff] %v770_v50 }
 0x1df   : > { %883 = vst [vmem:[%s1656_s26 + $0x50] sm:$0xff] %v765_v52  ;;  %v1215_v53 = vpop.f32.mrb[6].mxu1 }
 0x1e0   : > { %v780_v54 = vadd.f32 %v1215_v53, %v1652_v29  ;;  %v774_v55 = vpop.f32.mrb[7].mxu1 }
 0x1e1   : > { %v775_v56 = vadd.f32 %v1652_v29, %v774_v55 }
 0x1e2   : > { %886 = vst [vmem:[%s1656_s26 + $0x68] sm:$0xff] %v780_v54 }
 0x1e3   : > { %885 = vst [vmem:[%s1656_s26 + $0x60] sm:$0xff] %v775_v56  ;;  %v1218_v57 = vpop.f32.mrb[8].mxu1 }
 0x1e4   : > { %v790_v58 = vadd.f32 %v1218_v57, %v1652_v29  ;;  %v784_v60 = vpop.f32.mrb[9].mxu1 }
 0x1e5   : > { %v785_v61 = vadd.f32 %v1652_v29, %v784_v60 }
 0x1e6   : > { %888 = vst [vmem:[%s1656_s26 + $0x78] sm:$0xff] %v790_v58 }
 0x1e7   : > { %887 = vst [vmem:[%s1656_s26 + $0x70] sm:$0xff] %v785_v61  ;;  %v1221_v62 = vpop.f32.mrb[10].mxu1 }
 0x1e8   : > { %v800_v63 = vadd.f32 %v1221_v62, %v1652_v29  ;;  %v794_v0 = vpop.f32.mrb[11].mxu1 }
 0x1e9   : > { %v795_v1 = vadd.f32 %v1652_v29, %v794_v0 }
 0x1ea   : > { %890 = vst [vmem:[%s1656_s26 + $0x88] sm:$0xff] %v800_v63 }
 0x1eb   : > { %889 = vst [vmem:[%s1656_s26 + $0x80] sm:$0xff] %v795_v1  ;;  %v1224_v2 = vpop.f32.mrb[12].mxu1 }
 0x1ec   : > { %v810_v3 = vadd.f32 %v1224_v2, %v1652_v29  ;;  %v804_v4 = vpop.f32.mrb[13].mxu1 }
 0x1ed   : > { %v805_v5 = vadd.f32 %v1652_v29, %v804_v4 }
 0x1ee   : > { %892 = vst [vmem:[%s1656_s26 + $0x98] sm:$0xff] %v810_v3 }
 0x1ef   : > { %891 = vst [vmem:[%s1656_s26 + $0x90] sm:$0xff] %v805_v5  ;;  %v1227_v6 = vpop.f32.mrb[14].mxu1 }
 0x1f0   : > { %v820_v7 = vadd.f32 %v1227_v6, %v1652_v29  ;;  %v814_v8 = vpop.f32.mrb[15].mxu1 }
 0x1f1   : > { %v815_v9 = vadd.f32 %v1652_v29, %v814_v8 }
 0x1f2   : > { %894 = vst [vmem:[%s1656_s26 + $0xa8] sm:$0xff] %v820_v7 }
 0x1f3   : > { %893 = vst [vmem:[%s1656_s26 + $0xa0] sm:$0xff] %v815_v9  ;;  %v1230_v10 = vpop.f32.mrb[16].mxu1 }
 0x1f4   : > { %v830_v11 = vadd.f32 %v1230_v10, %v1652_v29  ;;  %v824_v12 = vpop.f32.mrb[17].mxu1 }
 0x1f5   : > { %v825_v13 = vadd.f32 %v1652_v29, %v824_v12 }
 0x1f6   : > { %896 = vst [vmem:[%s1656_s26 + $0xb8] sm:$0xff] %v830_v11 }
 0x1f7   : > { %895 = vst [vmem:[%s1656_s26 + $0xb0] sm:$0xff] %v825_v13  ;;  %v1233_v14 = vpop.f32.mrb[18].mxu1 }
 0x1f8   : > { %v840_v15 = vadd.f32 %v1233_v14, %v1652_v29  ;;  %v834_v16 = vpop.f32.mrb[19].mxu1 }
 0x1f9   : > { %v835_v17 = vadd.f32 %v1652_v29, %v834_v16 }
 0x1fa   : > { %898 = vst [vmem:[%s1656_s26 + $0xc8] sm:$0xff] %v840_v15 }
 0x1fb   : > { %897 = vst [vmem:[%s1656_s26 + $0xc0] sm:$0xff] %v835_v17  ;;  %v1236_v18 = vpop.f32.mrb[20].mxu1 }
 0x1fc   : > { %v850_v19 = vadd.f32 %v1236_v18, %v1652_v29  ;;  %v844_v20 = vpop.f32.mrb[21].mxu1 }
 0x1fd   : > { %v845_v21 = vadd.f32 %v1652_v29, %v844_v20 }
 0x1fe   : > { %900 = vst [vmem:[%s1656_s26 + $0xd8] sm:$0xff] %v850_v19 }
 0x1ff   : > { %899 = vst [vmem:[%s1656_s26 + $0xd0] sm:$0xff] %v845_v21  ;;  %v1239_v22 = vpop.f32.mrb[22].mxu1 }
 0x200   : > { %v860_v23 = vadd.f32 %v1239_v22, %v1652_v29  ;;  %v854_v24 = vpop.f32.mrb[23].mxu1 }
 0x201   : > { %v855_v25 = vadd.f32 %v1652_v29, %v854_v24 }
 0x202   : > { %902 = vst [vmem:[%s1656_s26 + $0xe8] sm:$0xff] %v860_v23 }
 0x203   : > { %901 = vst [vmem:[%s1656_s26 + $0xe0] sm:$0xff] %v855_v25  ;;  %v1242_v26 = vpop.f32.mrb[24].mxu1 }
 0x204   : > { %v870_v27 = vadd.f32 %v1242_v26, %v1652_v29  ;;  %v864_v28 = vpop.f32.mrb[25].mxu1 }
 0x205   : > { %v865_v30 = vadd.f32 %v1652_v29, %v864_v28 }
 0x206   : > { %904 = vst [vmem:[%s1656_s26 + $0xf8] sm:$0xff] %v870_v27 }
 0x207   : > { %903 = vst [vmem:[%s1656_s26 + $0xf0] sm:$0xff] %v865_v30 }
 0x208   : > { %1352 = shalt.err (!%p1349_p3)
}
 0x209   : > { %s1353_s15 = scalar_lea.hbm %s1722_s9, 4096  ;;  %s1357_s17 = scalar_lea.hbm %s1777_s5, 8192 }
 0x20a   : > { %p1354_p4 = scmp.ne.s32.totalorder %s1722_s9, %s1353_s15  ;;  %p1358_p9 = scmp.lt.u32.totalorder %s1722_s9, %s1777_s5 }
 0x20b   : > { %p1359_p10 = scmp.lt.u32.totalorder %s1357_s17, %s1353_s15  ;;  %p1361_p12 = scmp.lt.u32.totalorder %s1353_s15, %s1722_s9 }
 0x20c   : > { %p1355_p7 = pnand %p1354_p4, %p1475_p5 }
 0x20d   : > { %p1360_p11 = por %p1359_p10, %p1358_p9 }
 0x20e   : > { %p1356_p8 = pneg %p1355_p7 }
 0x20f   : > { %p1362_p13 = por %p1361_p12, %p1360_p11 }
 0x211   : > { %p1363_p0 = pnand %p1362_p13, %p1356_p8 }
 0x213   : > { %1366 = shalt.err (!%p1363_p0)
}
 0x214   : > { %s1405_s26 = smov 128   ;;  %s1406_s6 = smov 8  }
 0x215   : > { %1297 = dma.vmem_to_hbm [thread:$0]  (%p1475_p5), %s1724_s7, 4096, %s1722_s9, %s1731_s22, %s1405_s26, %s1405_s26, %s1406_s6  }
 0x216 PF: > { %p1303_p1 = scmp.ge.s32.totalorder %s1401_s21, 2  ;;  %s934_s8 = sand.u32 1, %s1389_s18  }
 0x217   : > { %s935_s10 = scalar_lea.sflag [#allocation3], %s934_s8 }
 0x218   : > { %p1300_p2 = pnand %p1303_p1, %p1479_p6 }
 0x21a   : > { %1384 = dma.done.wait (!%p1300_p2), %s935_s10, 4096  }
 0x21b   : > { %1386 = vsyncadd (!%p1300_p2), %s935_s10, 4294963200  ;;  %p15_p3 = scmp.ge.s32.totalorder %s1462_s24, 4   ;;  %s1780_s18 = smov %s1393_s19 }
 0x21c   : > { %s1781_s19 = smov %s1397_s20  ;;  %s1782_s20 = smov %s1473_s27 }
 0x21d   : > { %s1783_s21 = smov %s1462_s24  ;;  %17 = sbr.rel (!%p15_p3) target bundleno = 3 (0x3), region = 75 }
 0x224   :  { %940 = vsyncpa [#allocation3], 1 }
 0x225   :  { %942 = vsyncpa [#allocation3 + $0x1], 1 }

</bundles_post_ra>
